<compile_context>
chip_gen: v7x
topology: tpu7x:2x2x1
jax: 0.10.0
libtpu: 0.0.40
codegen_flags: <defaults>
</compile_context>

<pallas_src>
import jax
import jax.numpy as jnp
from jax import lax
from jax.experimental import pallas as pl
from jax.experimental.pallas import tpu as pltpu

# ---------------- config (small, consistent with the module) ----------------
EMBEDDING_TOKENS = 50
EMBEDDING_FEATURES = 16   # config.embedding_features
RNN_HIDDEN = 32           # config.rnn_hidden_size
OUTPUT_SIZE = 4           # config.output_size
OUTPUT_FEATURES = 8       # config.output_features
VISION_FEATURES = OUTPUT_SIZE * OUTPUT_SIZE * OUTPUT_FEATURES  # 128
MID_FEATURES = 64         # config.mid_features
MAX_ANSWERS = 16          # config.max_answers

BATCH = 2
SEQ = 8

LANES = 128

# ---- packed parameter slab layout (row offsets 8-aligned; lanes padded) ----
ROW_EMB = 0       # (50, 16)
ROW_WIH = 56      # (16, 32)   W_ih^T
ROW_WHH = 72      # (32, 32)   W_hh^T
ROW_BRNN = 104    # (1, 32)    b_ih + b_hh
ROW_W1V = 112     # (128, 64)  lin1 weight, vision block
ROW_W1Q = 240     # (32, 64)   lin1 weight, text block
ROW_B1 = 272      # (1, 64)
ROW_W2 = 280      # (64, 16)   zero-padded to 128 lanes -> lane-dense output
ROW_B2 = 344      # (1, 16)    zero-padded to 128 lanes
SLAB_ROWS = 352

# ---- packed activation slab layout ----
ACT_V0 = 0        # (B, 128)    flattened vision features
ACT_W0 = 8        # (B, S)      step weights = (t < q_lens[b]) / max(q_lens)
ACT_Q0 = 16       # (S*B, 1)    time-major token ids stored as exact f32 ints
ACT_ROWS = ACT_Q0 + SEQ * BATCH  # 32

_VMEM = pl.BlockSpec(memory_space=pltpu.MemorySpace.VMEM)


# ------------------------------ fused kernel ---------------------------------
def fused_net_kernel(params_ref, act_ref, out_ref):
    """Embedding -> tanh -> tanh-RNN (packed-seq mask folded into weights) ->
    weighted mean over T -> L2-norm(v) -> concat (split matmul) -> Linear ->
    ReLU -> Linear.  Two VMEM inputs (param slab + activation slab), one
    lane-dense output."""
    # ---- static views into the packed parameter slab (8-row aligned) ----
    emb_w = params_ref[ROW_EMB:ROW_EMB + EMBEDDING_TOKENS, 0:EMBEDDING_FEATURES]
    wih = params_ref[ROW_WIH:ROW_WIH + EMBEDDING_FEATURES, 0:RNN_HIDDEN]
    whh = params_ref[ROW_WHH:ROW_WHH + RNN_HIDDEN, 0:RNN_HIDDEN]
    b_rnn = params_ref[ROW_BRNN:ROW_BRNN + 1, 0:RNN_HIDDEN]
    w1v = params_ref[ROW_W1V:ROW_W1V + VISION_FEATURES, 0:MID_FEATURES]
    w1q = params_ref[ROW_W1Q:ROW_W1Q + RNN_HIDDEN, 0:MID_FEATURES]
    b1 = params_ref[ROW_B1:ROW_B1 + 1, 0:MID_FEATURES]
    w2 = params_ref[ROW_W2:ROW_W2 + MID_FEATURES, :]     # (64, 128) lane-padded
    b2 = params_ref[ROW_B2:ROW_B2 + 1, :]                 # (1, 128) lane-padded

    # ---- activations ----
    v = act_ref[ACT_V0:ACT_V0 + BATCH, :]                 # (B, 128) == (B, Dv)
    step_w = act_ref[ACT_W0:ACT_W0 + BATCH, 0:SEQ]        # (B, S) mask / max_len
    idx = act_ref[ACT_Q0:ACT_Q0 + SEQ * BATCH, 0:1].astype(jnp.int32)  # (S*B, 1)

    # ---- TextProcessor: embedding lookup as gather-free one-hot matmul ----
    SB = SEQ * BATCH
    token_iota = lax.broadcasted_iota(jnp.int32, (SB, EMBEDDING_TOKENS), 1)
    onehot = (token_iota == idx).astype(jnp.float32)       # (S*B, V)
    # tanh(embedding) hoisted out of the recurrent loop.
    x = jnp.tanh(jnp.dot(onehot, emb_w, preferred_element_type=jnp.float32))
    # Hoisted input projection + folded bias: one matmul instead of S tiny ones.
    xwb = jnp.dot(x, wih, preferred_element_type=jnp.float32) + b_rnn  # (S*B, H)

    # Fully unrolled recurrence: only h @ W_hh + tanh sits on the serial chain.
    h = jnp.zeros((BATCH, RNN_HIDDEN), jnp.float32)
    q_mean = jnp.zeros((BATCH, RNN_HIDDEN), jnp.float32)
    for t in range(SEQ):
        pre = xwb[t * BATCH:(t + 1) * BATCH, :] + jnp.dot(
            h, whh, preferred_element_type=jnp.float32)
        h = jnp.tanh(pre)                                  # (B, H)
        # step weights already contain the packed-seq mask and 1/max_len.
        q_mean = q_mean + h * step_w[:, t:t + 1]

    # ---- classifier: L2-normalize v, concat via split matmul, MLP ----
    norm = jnp.sqrt(jnp.sum(v * v, axis=1, keepdims=True))  # (B, 1)
    vn = v / (norm + 1e-8)                                   # exact divide

    hid = (jnp.dot(vn, w1v, preferred_element_type=jnp.float32)
           + jnp.dot(q_mean, w1q, preferred_element_type=jnp.float32)
           + b1)
    hid = jnp.maximum(hid, 0.0)                              # ReLU
    # Lane-dense (B, 128) store; columns 16..127 of w2/b2 are zero-padded.
    out_ref[...] = (jnp.dot(hid, w2, preferred_element_type=jnp.float32) + b2)


# -------------------------------- wrapper -------------------------------------
@jax.jit
def net_forward(v, q, q_lens, param_slab):
    """Full Net.forward.  v: (B, C, H, W) NCHW;  q: (B, S) int32;  q_lens: (B,)."""
    B, S = q.shape
    assert B == BATCH and S == SEQ, "kernel is specialized to (BATCH, SEQ)"

    # Tiny layout plumbing only; all dense math runs inside the fused kernel.
    v_flat = v.reshape(B, -1).astype(jnp.float32)            # (B, 128)
    lens_f = q_lens.astype(jnp.float32)                      # (B,)
    # torch.mean over the padded time axis divides by max(q_lens)
    # (pad_packed_sequence width).  Guard the (torch-invalid) all-zero case.
    max_len = jnp.maximum(jnp.max(lens_f), 1.0)
    t_iota = jnp.arange(S, dtype=jnp.float32)[None, :]       # (1, S)
    step_w = (t_iota < lens_f[:, None]).astype(jnp.float32) / max_len  # (B, S)
    # Time-major token ids (row = t*B + b) stored as exact small-int floats.
    q_f = jnp.transpose(q).reshape(S * B, 1).astype(jnp.float32)

    act = jnp.zeros((ACT_ROWS, LANES), jnp.float32)
    act = act.at[ACT_V0:ACT_V0 + B, :].set(v_flat)
    act = act.at[ACT_W0:ACT_W0 + B, 0:S].set(step_w)
    act = act.at[ACT_Q0:ACT_Q0 + S * B, 0:1].set(q_f)

    out = pl.pallas_call(
        fused_net_kernel,
        out_shape=jax.ShapeDtypeStruct((B, LANES), jnp.float32),
        in_specs=[_VMEM, _VMEM],
        out_specs=_VMEM,
        cost_estimate=pl.CostEstimate(
            flops=150_000, transcendentals=800, bytes_accessed=200_000),
    )(param_slab, act)
    return out[:, :MAX_ANSWERS]


# --------------------------- deterministic params ------------------------------
def xavier_uniform(key, fan_in, fan_out):
    bound = jnp.sqrt(6.0 / (fan_in + fan_out))
    return jax.random.uniform(key, (fan_in, fan_out), jnp.float32, -bound, bound)


def init_params(key):
    ks = jax.random.split(key, 8)
    H, E = RNN_HIDDEN, EMBEDDING_FEATURES
    Din = VISION_FEATURES + RNN_HIDDEN
    rnn_bound = 1.0 / jnp.sqrt(H)
    params = {
        # embedding (xavier_uniform overwrites the padding row, same as PyTorch)
        "emb_w": xavier_uniform(ks[0], EMBEDDING_TOKENS, E),
        # RNN weights stored transposed: x @ W_ih^T, h @ W_hh^T
        "w_ih_t": jax.random.uniform(ks[1], (E, H), jnp.float32,
                                     -rnn_bound, rnn_bound),
        "w_hh_t": jax.random.uniform(ks[2], (H, H), jnp.float32,
                                     -rnn_bound, rnn_bound),
        "b_rnn": jax.random.uniform(ks[3], (1, H), jnp.float32,
                                    -rnn_bound, rnn_bound),        # b_ih + b_hh
        # classifier lin1: weight (in, out) split into vision/text blocks
        "b1": jnp.zeros((1, MID_FEATURES), jnp.float32),
        "w2": xavier_uniform(ks[6], MID_FEATURES, MAX_ANSWERS),
        "b2": jnp.zeros((1, MAX_ANSWERS), jnp.float32),
    }
    w1 = xavier_uniform(ks[4], Din, MID_FEATURES)
    params["w1v"] = w1[:VISION_FEATURES]
    params["w1q"] = w1[VISION_FEATURES:]
    return params


def pack_param_slab(p):
    """Pack all weights into one lane-dense (SLAB_ROWS, 128) f32 slab."""
    slab = jnp.zeros((SLAB_ROWS, LANES), jnp.float32)

    def put(s, row, a):
        r, c = a.shape
        return s.at[row:row + r, 0:c].set(a.astype(jnp.float32))

    slab = put(slab, ROW_EMB, p["emb_w"])
    slab = put(slab, ROW_WIH, p["w_ih_t"])
    slab = put(slab, ROW_WHH, p["w_hh_t"])
    slab = put(slab, ROW_BRNN, p["b_rnn"])
    slab = put(slab, ROW_W1V, p["w1v"])
    slab = put(slab, ROW_W1Q, p["w1q"])
    slab = put(slab, ROW_B1, p["b1"])
    slab = put(slab, ROW_W2, p["w2"])   # lanes 16..127 stay zero
    slab = put(slab, ROW_B2, p["b2"])   # lanes 16..127 stay zero
    return slab


# ------------------------------ pure-JAX reference ------------------------------
def reference_forward(v, q, q_lens, params):
    B, S = q.shape
    emb = jnp.take(params["emb_w"], q, axis=0)
    x = jnp.tanh(emb)
    max_len = jnp.max(q_lens).astype(jnp.float32)
    h = jnp.zeros((B, RNN_HIDDEN), jnp.float32)
    acc = jnp.zeros((B, RNN_HIDDEN), jnp.float32)
    for t in range(S):
        h = jnp.tanh(x[:, t, :] @ params["w_ih_t"] + h @ params["w_hh_t"]
                     + params["b_rnn"])
        m = (t < q_lens).astype(jnp.float32)[:, None]
        acc = acc + h * m
    q_mean = acc / max_len
    v_flat = v.reshape(B, -1)
    vn = v_flat / (jnp.linalg.norm(v_flat, axis=1, keepdims=True) + 1e-8)
    hid = jnp.maximum(vn @ params["w1v"] + q_mean @ params["w1q"]
                      + params["b1"], 0.0)
    return hid @ params["w2"] + params["b2"]


# ------------------------------------ main --------------------------------------
if __name__ == "__main__":
    key = jax.random.PRNGKey(0)
    k_v, k_q, k_p = jax.random.split(key, 3)

    v = jax.random.normal(
        k_v, (BATCH, OUTPUT_FEATURES, OUTPUT_SIZE, OUTPUT_SIZE), jnp.float32)
    q = jax.random.randint(k_q, (BATCH, SEQ), 0, EMBEDDING_TOKENS, jnp.int32)
    q_lens = jnp.array([SEQ, SEQ - 3], dtype=jnp.int32)  # sorted descending

    params = init_params(k_p)
    param_slab = pack_param_slab(params)

    out = net_forward(v, q, q_lens, param_slab)
    out = jax.block_until_ready(out)

    ref = reference_forward(v, q, q_lens, params)
    assert out.shape == (BATCH, MAX_ANSWERS)
    assert jnp.allclose(out, ref, atol=1e-4, rtol=1e-4), (
        f"mismatch: max abs err {jnp.max(jnp.abs(out - ref))}")

    print("KERNEL_OK")
</pallas_src>

<mosaic_0001>
module attributes {stable_mosaic.version = 11 : i64} {
  func.func @fused_net_kernel(%arg0: memref<352x128xf32, #tpu.memory_space<vmem>>, %arg1: memref<32x128xf32, #tpu.memory_space<vmem>>, %arg2: memref<2x128xf32, #tpu.memory_space<vmem>>) attributes {dimension_semantics = [], scalar_prefetch = 0 : i64, scratch_operands = 0 : i64, tpu.core_type = #tpu.core_type<tc>} {
    %c0 = arith.constant 0 : index
    %c0_0 = arith.constant 0 : index
    %0 = vector.load %arg0[%c0, %c0_0] : memref<352x128xf32, #tpu.memory_space<vmem>>, vector<50x16xf32>
    %c56 = arith.constant 56 : index
    %c0_1 = arith.constant 0 : index
    %1 = vector.load %arg0[%c56, %c0_1] : memref<352x128xf32, #tpu.memory_space<vmem>>, vector<16x32xf32>
    %c72 = arith.constant 72 : index
    %c0_2 = arith.constant 0 : index
    %2 = vector.load %arg0[%c72, %c0_2] : memref<352x128xf32, #tpu.memory_space<vmem>>, vector<32x32xf32>
    %c104 = arith.constant 104 : index
    %c0_3 = arith.constant 0 : index
    %3 = vector.load %arg0[%c104, %c0_3] : memref<352x128xf32, #tpu.memory_space<vmem>>, vector<1x32xf32>
    %c112 = arith.constant 112 : index
    %c0_4 = arith.constant 0 : index
    %4 = vector.load %arg0[%c112, %c0_4] : memref<352x128xf32, #tpu.memory_space<vmem>>, vector<128x64xf32>
    %c240 = arith.constant 240 : index
    %c0_5 = arith.constant 0 : index
    %5 = vector.load %arg0[%c240, %c0_5] : memref<352x128xf32, #tpu.memory_space<vmem>>, vector<32x64xf32>
    %c272 = arith.constant 272 : index
    %c0_6 = arith.constant 0 : index
    %6 = vector.load %arg0[%c272, %c0_6] : memref<352x128xf32, #tpu.memory_space<vmem>>, vector<1x64xf32>
    %c280 = arith.constant 280 : index
    %c0_7 = arith.constant 0 : index
    %7 = vector.load %arg0[%c280, %c0_7] : memref<352x128xf32, #tpu.memory_space<vmem>>, vector<64x128xf32>
    %c344 = arith.constant 344 : index
    %c0_8 = arith.constant 0 : index
    %8 = vector.load %arg0[%c344, %c0_8] : memref<352x128xf32, #tpu.memory_space<vmem>>, vector<1x128xf32>
    %c0_9 = arith.constant 0 : index
    %c0_10 = arith.constant 0 : index
    %9 = vector.load %arg1[%c0_9, %c0_10] : memref<32x128xf32, #tpu.memory_space<vmem>>, vector<2x128xf32>
    %c8 = arith.constant 8 : index
    %c0_11 = arith.constant 0 : index
    %10 = vector.load %arg1[%c8, %c0_11] : memref<32x128xf32, #tpu.memory_space<vmem>>, vector<2x8xf32>
    %c16 = arith.constant 16 : index
    %c0_12 = arith.constant 0 : index
    %11 = vector.load %arg1[%c16, %c0_12] : memref<32x128xf32, #tpu.memory_space<vmem>>, vector<16x1xf32>
    %12 = arith.fptosi %11 : vector<16x1xf32> to vector<16x1xi32>
    %13 = tpu.iota {dimensions = array<i32: 1>} : vector<16x50xi32>
    %14 = vector.broadcast %12 : vector<16x1xi32> to vector<16x50xi32>
    %15 = arith.cmpi eq, %13, %14 : vector<16x50xi32>
    %16 = arith.extui %15 : vector<16x50xi1> to vector<16x50xi32>
    %17 = arith.sitofp %16 : vector<16x50xi32> to vector<16x50xf32>
    %cst = arith.constant dense<0.000000e+00> : vector<16x16xf32>
    %18 = tpu.matmul %17, %0, %cst {dimension_numbers = #tpu.dot_dimension_numbers<[1], [0], [0], [1], [0, 0, 1, 1], [], []>} : vector<16x50xf32>, vector<50x16xf32>, vector<16x16xf32> -> vector<16x16xf32>
    %19 = math.tanh %18 : vector<16x16xf32>
    %cst_13 = arith.constant dense<0.000000e+00> : vector<16x32xf32>
    %20 = tpu.matmul %19, %1, %cst_13 {dimension_numbers = #tpu.dot_dimension_numbers<[1], [0], [0], [1], [0, 0, 1, 1], [], []>} : vector<16x16xf32>, vector<16x32xf32>, vector<16x32xf32> -> vector<16x32xf32>
    %21 = vector.broadcast %3 : vector<1x32xf32> to vector<16x32xf32>
    %22 = arith.addf %20, %21 : vector<16x32xf32>
    %cst_14 = arith.constant 0.000000e+00 : f32
    %23 = vector.broadcast %cst_14 : f32 to vector<2x32xf32>
    %cst_15 = arith.constant 0.000000e+00 : f32
    %24 = vector.broadcast %cst_15 : f32 to vector<2x32xf32>
    %25 = vector.extract_strided_slice %22 {offsets = [0, 0], sizes = [2, 32], strides = [1, 1]} : vector<16x32xf32> to vector<2x32xf32>
    %cst_16 = arith.constant dense<0.000000e+00> : vector<2x32xf32>
    %26 = tpu.matmul %23, %2, %cst_16 {dimension_numbers = #tpu.dot_dimension_numbers<[1], [0], [0], [1], [0, 0, 1, 1], [], []>} : vector<2x32xf32>, vector<32x32xf32>, vector<2x32xf32> -> vector<2x32xf32>
    %27 = arith.addf %25, %26 : vector<2x32xf32>
    %28 = math.tanh %27 : vector<2x32xf32>
    %29 = vector.extract_strided_slice %10 {offsets = [0, 0], sizes = [2, 1], strides = [1, 1]} : vector<2x8xf32> to vector<2x1xf32>
    %30 = vector.broadcast %29 : vector<2x1xf32> to vector<2x32xf32>
    %31 = arith.mulf %28, %30 : vector<2x32xf32>
    %32 = arith.addf %24, %31 : vector<2x32xf32>
    %33 = vector.extract_strided_slice %22 {offsets = [2, 0], sizes = [2, 32], strides = [1, 1]} : vector<16x32xf32> to vector<2x32xf32>
    %cst_17 = arith.constant dense<0.000000e+00> : vector<2x32xf32>
    %34 = tpu.matmul %28, %2, %cst_17 {dimension_numbers = #tpu.dot_dimension_numbers<[1], [0], [0], [1], [0, 0, 1, 1], [], []>} : vector<2x32xf32>, vector<32x32xf32>, vector<2x32xf32> -> vector<2x32xf32>
    %35 = arith.addf %33, %34 : vector<2x32xf32>
    %36 = math.tanh %35 : vector<2x32xf32>
    %37 = vector.extract_strided_slice %10 {offsets = [0, 1], sizes = [2, 1], strides = [1, 1]} : vector<2x8xf32> to vector<2x1xf32>
    %38 = vector.broadcast %37 : vector<2x1xf32> to vector<2x32xf32>
    %39 = arith.mulf %36, %38 : vector<2x32xf32>
    %40 = arith.addf %32, %39 : vector<2x32xf32>
    %41 = vector.extract_strided_slice %22 {offsets = [4, 0], sizes = [2, 32], strides = [1, 1]} : vector<16x32xf32> to vector<2x32xf32>
    %cst_18 = arith.constant dense<0.000000e+00> : vector<2x32xf32>
    %42 = tpu.matmul %36, %2, %cst_18 {dimension_numbers = #tpu.dot_dimension_numbers<[1], [0], [0], [1], [0, 0, 1, 1], [], []>} : vector<2x32xf32>, vector<32x32xf32>, vector<2x32xf32> -> vector<2x32xf32>
    %43 = arith.addf %41, %42 : vector<2x32xf32>
    %44 = math.tanh %43 : vector<2x32xf32>
    %45 = vector.extract_strided_slice %10 {offsets = [0, 2], sizes = [2, 1], strides = [1, 1]} : vector<2x8xf32> to vector<2x1xf32>
    %46 = vector.broadcast %45 : vector<2x1xf32> to vector<2x32xf32>
    %47 = arith.mulf %44, %46 : vector<2x32xf32>
    %48 = arith.addf %40, %47 : vector<2x32xf32>
    %49 = vector.extract_strided_slice %22 {offsets = [6, 0], sizes = [2, 32], strides = [1, 1]} : vector<16x32xf32> to vector<2x32xf32>
    %cst_19 = arith.constant dense<0.000000e+00> : vector<2x32xf32>
    %50 = tpu.matmul %44, %2, %cst_19 {dimension_numbers = #tpu.dot_dimension_numbers<[1], [0], [0], [1], [0, 0, 1, 1], [], []>} : vector<2x32xf32>, vector<32x32xf32>, vector<2x32xf32> -> vector<2x32xf32>
    %51 = arith.addf %49, %50 : vector<2x32xf32>
    %52 = math.tanh %51 : vector<2x32xf32>
    %53 = vector.extract_strided_slice %10 {offsets = [0, 3], sizes = [2, 1], strides = [1, 1]} : vector<2x8xf32> to vector<2x1xf32>
    %54 = vector.broadcast %53 : vector<2x1xf32> to vector<2x32xf32>
    %55 = arith.mulf %52, %54 : vector<2x32xf32>
    %56 = arith.addf %48, %55 : vector<2x32xf32>
    %57 = vector.extract_strided_slice %22 {offsets = [8, 0], sizes = [2, 32], strides = [1, 1]} : vector<16x32xf32> to vector<2x32xf32>
    %cst_20 = arith.constant dense<0.000000e+00> : vector<2x32xf32>
    %58 = tpu.matmul %52, %2, %cst_20 {dimension_numbers = #tpu.dot_dimension_numbers<[1], [0], [0], [1], [0, 0, 1, 1], [], []>} : vector<2x32xf32>, vector<32x32xf32>, vector<2x32xf32> -> vector<2x32xf32>
    %59 = arith.addf %57, %58 : vector<2x32xf32>
    %60 = math.tanh %59 : vector<2x32xf32>
    %61 = vector.extract_strided_slice %10 {offsets = [0, 4], sizes = [2, 1], strides = [1, 1]} : vector<2x8xf32> to vector<2x1xf32>
    %62 = vector.broadcast %61 : vector<2x1xf32> to vector<2x32xf32>
    %63 = arith.mulf %60, %62 : vector<2x32xf32>
    %64 = arith.addf %56, %63 : vector<2x32xf32>
    %65 = vector.extract_strided_slice %22 {offsets = [10, 0], sizes = [2, 32], strides = [1, 1]} : vector<16x32xf32> to vector<2x32xf32>
    %cst_21 = arith.constant dense<0.000000e+00> : vector<2x32xf32>
    %66 = tpu.matmul %60, %2, %cst_21 {dimension_numbers = #tpu.dot_dimension_numbers<[1], [0], [0], [1], [0, 0, 1, 1], [], []>} : vector<2x32xf32>, vector<32x32xf32>, vector<2x32xf32> -> vector<2x32xf32>
    %67 = arith.addf %65, %66 : vector<2x32xf32>
    %68 = math.tanh %67 : vector<2x32xf32>
    %69 = vector.extract_strided_slice %10 {offsets = [0, 5], sizes = [2, 1], strides = [1, 1]} : vector<2x8xf32> to vector<2x1xf32>
    %70 = vector.broadcast %69 : vector<2x1xf32> to vector<2x32xf32>
    %71 = arith.mulf %68, %70 : vector<2x32xf32>
    %72 = arith.addf %64, %71 : vector<2x32xf32>
    %73 = vector.extract_strided_slice %22 {offsets = [12, 0], sizes = [2, 32], strides = [1, 1]} : vector<16x32xf32> to vector<2x32xf32>
    %cst_22 = arith.constant dense<0.000000e+00> : vector<2x32xf32>
    %74 = tpu.matmul %68, %2, %cst_22 {dimension_numbers = #tpu.dot_dimension_numbers<[1], [0], [0], [1], [0, 0, 1, 1], [], []>} : vector<2x32xf32>, vector<32x32xf32>, vector<2x32xf32> -> vector<2x32xf32>
    %75 = arith.addf %73, %74 : vector<2x32xf32>
    %76 = math.tanh %75 : vector<2x32xf32>
    %77 = vector.extract_strided_slice %10 {offsets = [0, 6], sizes = [2, 1], strides = [1, 1]} : vector<2x8xf32> to vector<2x1xf32>
    %78 = vector.broadcast %77 : vector<2x1xf32> to vector<2x32xf32>
    %79 = arith.mulf %76, %78 : vector<2x32xf32>
    %80 = arith.addf %72, %79 : vector<2x32xf32>
    %81 = vector.extract_strided_slice %22 {offsets = [14, 0], sizes = [2, 32], strides = [1, 1]} : vector<16x32xf32> to vector<2x32xf32>
    %cst_23 = arith.constant dense<0.000000e+00> : vector<2x32xf32>
    %82 = tpu.matmul %76, %2, %cst_23 {dimension_numbers = #tpu.dot_dimension_numbers<[1], [0], [0], [1], [0, 0, 1, 1], [], []>} : vector<2x32xf32>, vector<32x32xf32>, vector<2x32xf32> -> vector<2x32xf32>
    %83 = arith.addf %81, %82 : vector<2x32xf32>
    %84 = math.tanh %83 : vector<2x32xf32>
    %85 = vector.extract_strided_slice %10 {offsets = [0, 7], sizes = [2, 1], strides = [1, 1]} : vector<2x8xf32> to vector<2x1xf32>
    %86 = vector.broadcast %85 : vector<2x1xf32> to vector<2x32xf32>
    %87 = arith.mulf %84, %86 : vector<2x32xf32>
    %88 = arith.addf %80, %87 : vector<2x32xf32>
    %89 = arith.mulf %9, %9 : vector<2x128xf32>
    %cst_24 = arith.constant dense<0.000000e+00> : vector<2xf32>
    %90 = vector.multi_reduction <add>, %89, %cst_24 [1] : vector<2x128xf32> to vector<2xf32>
    %91 = vector.shape_cast %90 : vector<2xf32> to vector<2x1xf32>
    %92 = math.sqrt %91 : vector<2x1xf32>
    %cst_25 = arith.constant 9.99999993E-9 : f32
    %93 = vector.broadcast %cst_25 : f32 to vector<2x1xf32>
    %94 = arith.addf %92, %93 : vector<2x1xf32>
    %95 = vector.broadcast %94 : vector<2x1xf32> to vector<2x128xf32>
    %96 = arith.divf %9, %95 : vector<2x128xf32>
    %cst_26 = arith.constant dense<0.000000e+00> : vector<2x64xf32>
    %97 = tpu.matmul %96, %4, %cst_26 {dimension_numbers = #tpu.dot_dimension_numbers<[1], [0], [0], [1], [0, 0, 1, 1], [], []>} : vector<2x128xf32>, vector<128x64xf32>, vector<2x64xf32> -> vector<2x64xf32>
    %cst_27 = arith.constant dense<0.000000e+00> : vector<2x64xf32>
    %98 = tpu.matmul %88, %5, %cst_27 {dimension_numbers = #tpu.dot_dimension_numbers<[1], [0], [0], [1], [0, 0, 1, 1], [], []>} : vector<2x32xf32>, vector<32x64xf32>, vector<2x64xf32> -> vector<2x64xf32>
    %99 = arith.addf %97, %98 : vector<2x64xf32>
    %100 = vector.broadcast %6 : vector<1x64xf32> to vector<2x64xf32>
    %101 = arith.addf %99, %100 : vector<2x64xf32>
    %cst_28 = arith.constant 0.000000e+00 : f32
    %102 = vector.broadcast %cst_28 : f32 to vector<2x64xf32>
    %103 = arith.maximumf %101, %102 : vector<2x64xf32>
    %cst_29 = arith.constant dense<0.000000e+00> : vector<2x128xf32>
    %104 = tpu.matmul %103, %7, %cst_29 {dimension_numbers = #tpu.dot_dimension_numbers<[1], [0], [0], [1], [0, 0, 1, 1], [], []>} : vector<2x64xf32>, vector<64x128xf32>, vector<2x128xf32> -> vector<2x128xf32>
    %105 = vector.broadcast %8 : vector<1x128xf32> to vector<2x128xf32>
    %106 = arith.addf %104, %105 : vector<2x128xf32>
    %c0_30 = arith.constant 0 : index
    %c0_31 = arith.constant 0 : index
    %107 = vector.load %arg2[%c0_30, %c0_31] : memref<2x128xf32, #tpu.memory_space<vmem>>, vector<2x128xf32>
    tpu.vector_store %arg2[%c0_30, %c0_31], %106 {strides = array<i32>} : memref<2x128xf32, #tpu.memory_space<vmem>>, vector<2x128xf32>,
    return
  }
}

</mosaic_0001>

<bundles_post_ra>
// kernel: net_forward.1
= control target key start
LH: loop header
LB: loop body
LE: loop exit
PB: predicated region body
PF: predicated region fallthrough
CT: control target
= control target key end

     0   :  { %7 = vsyncpa [#allocation3], 0  ;;  %s1890_s0 = inlined_call_operand.hbm [shape: f32[352,128], index: 0, kind: input, shape index: {}]   ;;  %s1891_s1 = inlined_call_operand.vmem [shape: f32[32,128], index: 1, kind: input, shape index: {}]   ;;  %s1892_s2 = inlined_call_operand.hbm [shape: f32[2,128], index: 2, kind: output, shape index: {}]  }
   0x1   :  { %8 = vsyncpa [#allocation4], 0  ;;  %s1704_s9 = smov [#allocation2]   ;;  %s1656_s13 = scalar_lea.hbm %s1890_s0, 5632 }
   0x2   :  { %s14_s10 = sshll.u32 %s1704_s9, 4  ;;  %p1657_p0 = scmp.ne.s32.totalorder %s1890_s0, %s1656_s13  ;;  %s15_s10 = int_to_ptr.vmem [resolvable:$true] %s14_s10 }
   0x3   :  { %p1660_p1 = scmp.lt.u32.totalorder %s1656_s13, %s1890_s0 }
   0x5   :  { %p1662_p2 = pnand %p1660_p1, %p1657_p0 }
   0x7   :  { %1665 = shalt.err (!%p1662_p2)
}
   0x8   :  { %s1666_s18 = scalar_lea.vmem %s15_s10, 5632  ;;  %p1671_p4 = scmp.lt.s32.totalorder %s15_s10, %s15_s10 }
   0x9   :  { %p1667_p3 = scmp.ne.s32.totalorder %s15_s10, %s1666_s18  ;;  %p1672_p5 = scmp.lt.s32.totalorder %s1666_s18, %s1666_s18 }
   0xb   :  { %p1673_p6 = por %p1672_p5, %p1671_p4 }
   0xd   :  { %p1674_p7 = pnand %p1673_p6, %p1667_p3 }
   0xf   :  { %1677 = shalt.err (!%p1674_p7)
}
  0x10   :  { %s1705_s19 = smov 128   ;;  %s1706_s20 = smov 8  }
  0x11   :  { %20 = dma.hbm_to_vmem [thread:$0]  %s1890_s0, 5632, %s15_s10, [#allocation3], %s1705_s19, %s1705_s19, %s1706_s20  }
  0x12   :  { %1700 = dma.done.wait [#allocation3], 5632  }
  0x13   :  { %1701 = vsyncadd [#allocation3], 4294961664  ;;  %v1707_v0 = vmov 0   ;;  %v72_v1 = vld [vmem:[%s1891_s1 + $0x10] sm:$0xff]  ;;  %v73_v2 = vld [vmem:[%s1891_s1 + $0x18] sm:$0xff]  ;;  %vm97_vm0 = vcmask 1041408   ;;  %v76_v17 = vlaneseq }
  0x14   :  { %1623 = vset.pattern.permute.xlu0 %v1707_v0  ;;  %v26_v3 = vld [vmem:[#allocation2] sm:$0xff]  ;;  %v1604_v4 = vtrunc.f32 %v72_v1  ;;  %v1606_v5 = vtrunc.f32 %v73_v2  ;;  %v27_v6 = vld [vmem:[#allocation2 + $0x8] sm:$0xff]  ;;  %v28_v7 = vld [vmem:[#allocation2 + $0x10] sm:$0xff]  ;;  %vm90_vm1 = vcmask 408576   ;;  %v1708_v20 = vmov 0.0  }
  0x15   :  { %v29_v8 = vld [vmem:[#allocation2 + $0x18] sm:$0xff]  ;;  %v1498_v9 = vpack.c.bf16 %v27_v6, %v26_v3  ;;  %v30_v12 = vld [vmem:[#allocation2 + $0x20] sm:$0xff]  ;;  %v31_v13 = vld [vmem:[#allocation2 + $0x28] sm:$0xff]  ;;  %v77_v18 = vand.u32 127, %v76_v17  ;;  %v1709_v27 = vmov 0.0|0.0   ;;  %vm1710_vm4 = vmmov 0  }
  0x16   :  { %v1502_v10 = vpack.c.bf16 %v29_v8, %v28_v7  ;;  %v1605_v11 = vcvt.f32.s32 %v1604_v4  ;;  %v1607_v14 = vcvt.f32.s32 %v1606_v5  ;;  %v1506_v15 = vpack.c.bf16 %v31_v13, %v30_v12  ;;  %v32_v16 = vld [vmem:[#allocation2 + $0x30] sm:$0x3]  ;;  %v35_v24 = vld [vmem:[#allocation2 + $0x48] sm:$0xff]  ;;  %v33_v26 = vld [vmem:[#allocation2 + $0x38] sm:$0xff] }
  0x17   :  { %1499 = vmatprep.subr.bf16.mxu0 %v1498_v9  ;;  %v36_v25 = vld [vmem:[#allocation2 + $0x50] sm:$0xff]  ;;  %v34_v29 = vld [vmem:[#allocation2 + $0x40] sm:$0xff]  ;;  %v37_v31 = vld [vmem:[#allocation2 + $0x58] sm:$0xff]  ;;  %v1711_v35 = vmov 2   ;;  %vm182_vm5 = vcmask 130048   ;;  %v1712_v44 = vmov 1  }
  0x18   :  { %79 = vperm.xlu0 %1623, %v1605_v11   ;;  %1501 = vmatpush3.bf16.msra.mxu0 %v1498_v9  ;;  %v1758_v28 = vpack.c.bf16 %v36_v25, %v35_v24  ;;  %v1510_v30 = vpack.c.bf16 %v34_v29, %v33_v26  ;;  %v38_v32 = vld [vmem:[#allocation2 + $0x60] sm:$0xff]  ;;  %v1769_v34 = vld [vmem:[%s1891_s1 + $0x8] sm:$0x3]  ;;  %vm264_vm6 = vcmask 261120   ;;  %v1713_v4 = vmov 3  }
  0x19   :  { %1503 = vmatprep.subr.bf16.mxu0 %v1502_v10  ;;  %v1763_v33 = vpack.c.bf16 %v38_v32, %v37_v31  ;;  %v1793_v42 = vld [vmem:[%s1891_s1] sm:$0x3]  ;;  %1624 = vset.pattern.permute.xlu1 %v1712_v44  ;;  %v1223_v46 = vld [vmem:[#allocation2 + $0x68] ss:$0 sm:$0xff]  ;;  %vm1128_vm9 = vcmask 523264   ;;  %s1718_s1 = smov [#allocation5]  }
  0x1a   :  { %1511 = vmatprep.subr.bf16.mxu1 %v1510_v30  ;;  %v961_v43 = vmul.f32 %v1793_v42, %v1793_v42  ;;  %s1209_s30 = sshll.u32 %s1718_s1, 4  ;;  %s1210_s30 = int_to_ptr.vmem [resolvable:$true] %s1209_s30 }
  0x1b   :  { %1513 = vmatpush3.bf16.msra.mxu1 %v1510_v30  ;;  %v1715_v30 = vmov 5   ;;  %s1678_s3 = scalar_lea.vmem %s1210_s30, 32  ;;  %p1683_p9 = scmp.lt.s32.totalorder %s1210_s30, %s1210_s30 }
  0x1c   :  { %82 = vperm.xlu0 %1623, %v1607_v14   ;;  %1505 = vmatpush3.bf16.msra.mxu0 %v1502_v10  ;;  %v962_v45 = vsel %vm97_vm0, %v961_v43, 0.0  ;;  %p1679_p8 = scmp.ne.s32.totalorder %s1210_s30, %s1678_s3  ;;  %p1684_p10 = scmp.lt.s32.totalorder %s1678_s3, %s1678_s3 }
  0x1d   :  { %1507 = vmatprep.subr.bf16.mxu0 %v1506_v15  ;;  %1520 = vmatprep.subr.bf16.mxu1 %v1709_v27 }
  0x1e   :  { %963 = vadd.xlane.f32.xlu1 %v962_v45  ;;  %p1685_p11 = por %p1684_p10, %p1683_p9 }
  0x20   :  { %1509 = vmatpush3.bf16.msra.mxu0 %v1506_v15  ;;  %1625 = vset.pattern.permute.xlu0 %v1711_v35  ;;  %v1714_v15 = vmov 4   ;;  %p1686_p12 = pnand %p1685_p11, %p1679_p8 }
  0x21   :  { %1333 = vmatprep.subr.msk.mxu0 %vm97_vm0, %v32_v16  ;;  %515 = vperm.xlu0 %1625, %v1769_v34  }
  0x24   :  { %1334 = vmatpush3.msk.msra.mxu0 %vm97_vm0, %v32_v16 }
  0x25   :  { %1514 = vmatprep.subr.bf16.mxu0 %v1709_v27  ;;  %1626 = vset.pattern.permute.xlu0 %v1707_v0 }
  0x26   :  { %342 = vperm.xlu0 %1626, %v1769_v34  }
  0x2a   :  { %1628 = vset.pattern.permute.xlu0 %v1715_v30 }
  0x2b   :  { %774 = vperm.xlu0 %1628, %v1769_v34  }
  0x2f   :  { %426 = vperm.xlu1 %1624, %v1769_v34  }
  0x33   :  { %1627 = vset.pattern.permute.xlu1 %v1713_v4 }
  0x34   :  { %604 = vperm.xlu1 %1627, %v1769_v34  }
  0x38   :  { %1629 = vset.pattern.permute.xlu1 %v1714_v15  ;;  %v50_v15 = vld [vmem:[#allocation2 + $0xc0] sm:$0xff] }
  0x39   :  { %690 = vperm.xlu1 %1629, %v1769_v34  }
  0x97   :  { %v80_v19 = vpop.permute.xlu0 %79 }
  0x98   :  { %vm84_vm2 = vcmp.eq.s32.totalorder %v77_v18, %v80_v19 }
  0x99   :  { %v1218_v21 = vsel %vm84_vm2, 1.0, %v1708_v20 }
  0x9a   :  { %1335 = vmatprep.mubr.msk.f32.mxu0 %vm90_vm1, %v1218_v21 }
  0x9b   :  { %v83_v22 = vpop.permute.xlu0 %82 }
  0x9c   :  { %vm85_vm3 = vcmp.eq.s32.totalorder %v77_v18, %v83_v22 }
  0x9d   :  { %v1219_v23 = vsel %vm85_vm3, 1.0, %v1708_v20 }
  0x9e   :  { %1336 = vmatmul.mubr.msk.f32.vlgmr.msra.gmra.mrb[0].mxu0 %vm90_vm1, %v1219_v23 }
  0x9f   :  { %1516 = vmatpush3.bf16.msra.mxu0 %v1758_v28  ;;  %1353 = vmatprep.mubr.msk.f32.mxu0 %vm1710_vm4, %v1708_v20 }
  0xa0   :  { %1517 = vmatprep.subr.bf16.mxu0 %v1709_v27  ;;  %v516_v58 = vpop.permute.xlu0 %515 }
  0xa1   :  { %v517_v9 = vrot.slane %v516_v58, 4 }
  0xa3   :  { %1519 = vmatpush3.bf16.msra.mxu0 %v1763_v33 }
  0xa4   :  { %1526 = vmatprep.subr.bf16.mxu0 %v1709_v27 }
  0xa5   :  { %v343_v62 = vpop.permute.xlu0 %342 }
  0xa6   :  { %1354 = vmatmul.mubr.f32.vlgmr.msra.gmra.mrb[2].mxu0 %v1708_v20 }
  0xa7   :  { %1528 = vmatpush3.bf16.msra.mxu0 %v1758_v28  ;;  %1375 = vmatprep.mubr.msk.f32.mxu0 %vm1710_vm4, %v1708_v20 }
  0xa8   :  { %1529 = vmatprep.subr.bf16.mxu0 %v1709_v27 }
  0xab   :  { %1531 = vmatpush3.bf16.msra.mxu0 %v1763_v33  ;;  %v1808_v57 = vpop.xlane.xlu1 %963 }
  0xac   :  { %1538 = vmatprep.subr.bf16.mxu0 %v1709_v27  ;;  %vm967_vm7 = vcmp.eq.f32.partialorder %v1808_v57, inf  ;;  %vm969_vm8 = vcmp.eq.f32.partialorder %v1808_v57, 0.0 }
  0xaf   :  { %v427_v59 = vpop.permute.xlu1 %426 }
  0xb0   :  { %v428_v60 = vrot.slane %v427_v59, 6 }
  0xb3   :  { %v605_v21 = vpop.permute.xlu1 %604 }
  0xb4   :  { %v606_v22 = vrot.slane %v605_v21, 2  ;;  %v970_v21 = vand.u32 2147483648, %v1808_v57 }
 0x171   :  { %v1337_v36 = vpop.f32.mrb[0].mxu0 }
 0x172   :  { %v167_v37 = vpop.f32.mrb[1].mxu0 }
 0x173   :  { %1632 = vtanh.f32 %v167_v37 }
 0x174   :  { %1634 = vtanh.f32 %v1337_v36  ;;  %v691_v36 = vpop.permute.xlu1 %690 }
 0x179   :  { %v334_v40 = vpop.f32.mrb[2].mxu0 }
 0x17a   :  { %v1355_v41 = vpop.f32.mrb[3].mxu0 }
 0x17d   :  { %v1633_v38 = vpop.eup %1632 }
 0x17e   :  { %v1635_v39 = vpop.eup %1634  ;;  %1342 = vmatprep.mubr.msk.f32.mxu1 %vm182_vm5, %v1633_v38 }
 0x17f   :  { %1343 = vmatmul.mubr.msk.f32.vlgmr.msra.gmra.mrb[0].mxu1 %vm182_vm5, %v1635_v39 }
 0x180   :  { %1522 = vmatpush3.bf16.msra.mxu1 %v1758_v28  ;;  %1364 = vmatprep.mubr.msk.f32.mxu1 %vm1710_vm4, %v1708_v20 }
 0x181   :  { %1523 = vmatprep.subr.bf16.mxu1 %v1709_v27 }
 0x184   :  { %1525 = vmatpush3.bf16.msra.mxu1 %v1763_v33 }
 0x185   :  { %1532 = vmatprep.subr.bf16.mxu1 %v1709_v27 }
 0x252   :  { %v1344_v47 = vpop.f32.mrb[0].mxu1 }
 0x253   :  { %v1799_v48 = vadd.f32 %v1344_v47, %v1223_v46  ;;  %v255_v49 = vpop.f32.mrb[1].mxu1 }
 0x254   :  { %v256_v50 = vadd.f32 %v1223_v46, %v255_v49 }
 0x256   :  { %v338_v51 = vadd.f32 %v334_v40, %v256_v50  ;;  %v1716_v40 = vmov 6  }
 0x257   :  { %1630 = vset.pattern.permute.xlu1 %v1716_v40  ;;  %v59_v40 = vld [vmem:[#allocation2 + $0x108] sm:$0xff] }
 0x258   :  { %1636 = vtanh.f32 %v338_v51  ;;  %863 = vperm.xlu1 %1630, %v1769_v34  }
 0x262   :  { %v1637_v52 = vpop.eup %1636 }
 0x263   :  { %1365 = vmatmul.mubr.msk.f32.vlgmr.msra.gmra.mrb[2].mxu1 %vm264_vm6, %v1637_v52  ;;  %v345_v1 = vmul.f32 %v1637_v52, %v343_v62  ;;  %v1717_v52 = vmov 7  }
 0x264   :  { %1534 = vmatpush3.bf16.msra.mxu1 %v1758_v28  ;;  %1386 = vmatprep.mubr.msk.f32.mxu1 %vm1710_vm4, %v1708_v20 }
 0x265   :  { %1535 = vmatprep.subr.bf16.mxu1 %v1709_v27  ;;  %1631 = vset.pattern.permute.xlu0 %v1717_v52 }
 0x266   :  { %952 = vperm.xlu0 %1631, %v1769_v34  }
 0x268   :  { %1537 = vmatpush3.bf16.msra.mxu1 %v1763_v33 }
 0x269   :  { %1544 = vmatprep.subr.bf16.mxu1 %v1709_v27 }
 0x2d7   :  { %v864_v58 = vpop.permute.xlu1 %863 }
 0x2d8   :  { %v865_v59 = vrot.slane %v864_v58, 4 }
 0x336   :  { %v416_v53 = vpop.f32.mrb[2].mxu1 }
 0x337   :  { %v421_v54 = vrot.slane %v416_v53, 6  ;;  %v1366_v55 = vpop.f32.mrb[3].mxu1 }
 0x339   :  { %v423_v56 = vadd.f32 %v421_v54, %v256_v50 }
 0x33b   :  { %1638 = vtanh.f32 %v423_v56 }
 0x345   :  { %v1639_v61 = vpop.eup %1638 }
 0x346   :  { %v430_v63 = vmul.f32 %v1639_v61, %v428_v60  ;;  %v436_v0 = vrot.slane %v1639_v61, 2  ;;  %v40_v60 = vld [vmem:[#allocation2 + $0x70] sm:$0xff]  ;;  %v41_v61 = vld [vmem:[#allocation2 + $0x78] sm:$0xff] }
 0x348   :  { %v432_v2 = vrot.slane %v430_v63, 2  ;;  %1376 = vmatmul.mubr.msk.f32.vlgmr.msra.gmra.mrb[4].mxu0 %vm264_vm6, %v436_v0  ;;  %v1569_v63 = vpack.c.bf16 %v41_v61, %v40_v60  ;;  %v66_v60 = vld [vmem:[#allocation2 + $0x140] sm:$0xff] }
 0x349   :  { %1540 = vmatpush3.bf16.msra.mxu0 %v1758_v28  ;;  %1397 = vmatprep.mubr.msk.f32.mxu0 %vm1710_vm4, %v1708_v20 }
 0x34a   :  { %v434_v3 = vadd.f32 %v432_v2, %v345_v1  ;;  %1541 = vmatprep.subr.bf16.mxu0 %v1709_v27  ;;  %v42_v2 = vld [vmem:[#allocation2 + $0x80] sm:$0xff] }
 0x34d   :  { %1543 = vmatpush3.bf16.msra.mxu0 %v1763_v33 }
 0x34e   :  { %1550 = vmatprep.subr.bf16.mxu0 %v1709_v27 }
 0x41b   :  { %v505_v5 = vpop.f32.mrb[4].mxu0 }
 0x41c   :  { %v510_v6 = vrot.slane %v505_v5, 4  ;;  %v1377_v7 = vpop.f32.mrb[5].mxu0 }
 0x41d   :  { %v45_v7 = vld [vmem:[#allocation2 + $0x98] sm:$0xff] }
 0x41e   :  { %v512_v8 = vadd.f32 %v510_v6, %v256_v50  ;;  %v44_v6 = vld [vmem:[#allocation2 + $0x90] sm:$0xff] }
 0x420   :  { %1640 = vtanh.f32 %v512_v8  ;;  %v1575_v8 = vpack.c.bf16 %v45_v7, %v44_v6 }
 0x42a   :  { %v1641_v10 = vpop.eup %1640 }
 0x42b   :  { %v525_v11 = vrot.slane %v1641_v10, 4  ;;  %v519_v12 = vmul.f32 %v1641_v10, %v517_v9  ;;  %v46_v9 = vld [vmem:[#allocation2 + $0xa0] sm:$0xff]  ;;  %v47_v10 = vld [vmem:[#allocation2 + $0xa8] sm:$0xff] }
 0x42d   :  { %1387 = vmatmul.mubr.msk.f32.vlgmr.msra.gmra.mrb[4].mxu1 %vm264_vm6, %v525_v11  ;;  %v521_v13 = vrot.slane %v519_v12, 4  ;;  %v1578_v11 = vpack.c.bf16 %v47_v10, %v46_v9  ;;  %v48_v12 = vld [vmem:[#allocation2 + $0xb0] sm:$0xff] }
 0x42e   :  { %1546 = vmatpush3.bf16.msra.mxu1 %v1758_v28  ;;  %1408 = vmatprep.mubr.msk.f32.mxu1 %vm1710_vm4, %v1708_v20 }
 0x42f   :  { %1547 = vmatprep.subr.bf16.mxu1 %v1709_v27  ;;  %v523_v14 = vadd.f32 %v521_v13, %v434_v3  ;;  %v43_v3 = vld [vmem:[#allocation2 + $0x88] sm:$0xff]  ;;  %v49_v13 = vld [vmem:[#allocation2 + $0xb8] sm:$0xff] }
 0x430   :  { %v1572_v34 = vpack.c.bf16 %v43_v3, %v42_v2 }
 0x432   :  { %1549 = vmatpush3.bf16.msra.mxu1 %v1763_v33 }
 0x433   :  { %1556 = vmatprep.subr.bf16.mxu1 %v1709_v27 }
 0x500   :  { %v594_v16 = vpop.f32.mrb[4].mxu1 }
 0x501   :  { %v599_v17 = vrot.slane %v594_v16, 2  ;;  %v1388_v18 = vpop.f32.mrb[5].mxu1  ;;  %v51_v16 = vld [vmem:[#allocation2 + $0xc8] sm:$0xff] }
 0x503   :  { %v601_v19 = vadd.f32 %v599_v17, %v256_v50  ;;  %v1584_v17 = vpack.c.bf16 %v51_v16, %v50_v15 }
 0x505   :  { %1642 = vtanh.f32 %v601_v19 }
 0x50f   :  { %v1643_v23 = vpop.eup %1642 }
 0x510   :  { %v608_v24 = vmul.f32 %v1643_v23, %v606_v22  ;;  %v614_v25 = vrot.slane %v1643_v23, 6 }
 0x512   :  { %v610_v26 = vrot.slane %v608_v24, 6  ;;  %1398 = vmatmul.mubr.msk.f32.vlgmr.msra.gmra.mrb[6].mxu0 %vm264_vm6, %v614_v25  ;;  %v52_v25 = vld [vmem:[#allocation2 + $0xd0] sm:$0xff] }
 0x513   :  { %1552 = vmatpush3.bf16.msra.mxu0 %v1758_v28  ;;  %1419 = vmatprep.mubr.msk.f32.mxu0 %vm1710_vm4, %v1708_v20 }
 0x514   :  { %v612_v29 = vadd.f32 %v610_v26, %v523_v14  ;;  %1553 = vmatprep.subr.bf16.mxu0 %v1709_v27  ;;  %v1581_v14 = vpack.c.bf16 %v49_v13, %v48_v12  ;;  %v53_v26 = vld [vmem:[#allocation2 + $0xd8] sm:$0xff] }
 0x517   :  { %1555 = vmatpush3.bf16.msra.mxu0 %v1763_v33 }
 0x518   :  { %1562 = vmatprep.subr.bf16.mxu0 %v1709_v27 }
 0x5e5   :  { %v683_v31 = vpop.f32.mrb[6].mxu0 }
 0x5e6   :  { %v687_v32 = vadd.f32 %v683_v31, %v1799_v48  ;;  %v1399_v35 = vpop.f32.mrb[7].mxu0  ;;  %v54_v31 = vld [vmem:[#allocation2 + $0xe0] sm:$0xff] }
 0x5e8   :  { %1644 = vtanh.f32 %v687_v32  ;;  %v55_v32 = vld [vmem:[#allocation2 + $0xe8] sm:$0xff] }
 0x5e9   :  { %v1590_v35 = vpack.c.bf16 %v55_v32, %v54_v31 }
 0x5f2   :  { %v1645_v37 = vpop.eup %1644 }
 0x5f3   :  { %v693_v38 = vmul.f32 %v1645_v37, %v691_v36  ;;  %1409 = vmatmul.mubr.msk.f32.vlgmr.msra.gmra.mrb[6].mxu1 %vm264_vm6, %v1645_v37  ;;  %v56_v37 = vld [vmem:[#allocation2 + $0xf0] sm:$0xff] }
 0x5f4   :  { %1558 = vmatpush3.bf16.msra.mxu1 %v1758_v28  ;;  %1430 = vmatprep.mubr.msk.f32.mxu1 %vm1710_vm4, %v1708_v20  ;;  %v775_v28 = vpop.permute.xlu0 %774 }
 0x5f5   :  { %v694_v39 = vadd.f32 %v693_v38, %v612_v29  ;;  %1559 = vmatprep.subr.bf16.mxu1 %v1709_v27  ;;  %v776_v46 = vrot.slane %v775_v28, 6  ;;  %v1587_v29 = vpack.c.bf16 %v53_v26, %v52_v25  ;;  %v57_v38 = vld [vmem:[#allocation2 + $0xf8] sm:$0xff] }
 0x5f8   :  { %1561 = vmatpush3.bf16.msra.mxu1 %v1763_v33 }
 0x5f9   :  { %1568 = vmatprep.subr.bf16.mxu1 %v1709_v27 }
 0x6c6   :  { %v764_v41 = vpop.f32.mrb[6].mxu1 }
 0x6c7   :  { %v769_v43 = vrot.slane %v764_v41, 6  ;;  %v1410_v44 = vpop.f32.mrb[7].mxu1 }
 0x6c9   :  { %v771_v45 = vadd.f32 %v769_v43, %v1799_v48 }
 0x6cb   :  { %1646 = vtanh.f32 %v771_v45 }
 0x6d5   :  { %v1647_v47 = vpop.eup %1646 }
 0x6d6   :  { %v778_v49 = vmul.f32 %v1647_v47, %v776_v46  ;;  %v784_v50 = vrot.slane %v1647_v47, 2 }
 0x6d8   :  { %v780_v51 = vrot.slane %v778_v49, 2  ;;  %1420 = vmatmul.mubr.msk.f32.vlgmr.msra.gmra.mrb[8].mxu0 %vm264_vm6, %v784_v50  ;;  %v61_v50 = vld [vmem:[#allocation2 + $0x118] sm:$0xff] }
 0x6d9   :  { %1441 = vmatprep.mubr.msk.f32.mxu0 %vm1710_vm4, %v1708_v20 }
 0x6da   :  { %v782_v33 = vadd.f32 %v780_v51, %v694_v39  ;;  %v58_v39 = vld [vmem:[#allocation2 + $0x100] sm:$0xff] }
 0x6db   :  { %v1566_v41 = vpack.c.bf16 %v59_v40, %v58_v39  ;;  %v62_v51 = vld [vmem:[#allocation2 + $0x120] sm:$0xff] }
 0x6dc   :  { %v1593_v52 = vpack.c.bf16 %v62_v51, %v61_v50 }
 0x7ab   :  { %v853_v53 = vpop.f32.mrb[8].mxu0 }
 0x7ac   :  { %v858_v54 = vrot.slane %v853_v53, 4  ;;  %v1421_v55 = vpop.f32.mrb[9].mxu0 }
 0x7ad   :  { %v64_v55 = vld [vmem:[#allocation2 + $0x130] sm:$0xff] }
 0x7ae   :  { %v860_v56 = vadd.f32 %v858_v54, %v1799_v48  ;;  %v63_v54 = vld [vmem:[#allocation2 + $0x128] sm:$0xff] }
 0x7b0   :  { %1648 = vtanh.f32 %v860_v56  ;;  %v1596_v56 = vpack.c.bf16 %v64_v55, %v63_v54 }
 0x7b1   :  { %1650 = vrsqrt.f32 %v1808_v57 }
 0x7ba   :  { %v1649_v62 = vpop.eup %1648 }
 0x7bb   :  { %v867_v0 = vmul.f32 %v1649_v62, %v865_v59  ;;  %v873_v1 = vrot.slane %v1649_v62, 4  ;;  %v1651_v18 = vpop.eup %1650  ;;  %v65_v59 = vld [vmem:[#allocation2 + $0x138] sm:$0xff]  ;;  %v67_v62 = vld [vmem:[#allocation2 + $0x148] sm:$0xff] }
 0x7bc   :  { %v966_v19 = vmul.f32 %v1651_v18, %v1808_v57  ;;  %v1599_v61 = vpack.c.bf16 %v66_v60, %v65_v59 }
 0x7bd   :  { %v869_v4 = vrot.slane %v867_v0, 4  ;;  %1431 = vmatmul.mubr.msk.f32.vlgmr.msra.gmra.mrb[8].mxu1 %vm264_vm6, %v873_v1  ;;  %v1234_v1 = vld [vmem:[#allocation2 + $0x110] ss:$0 sm:$0xff] }
 0x7be   :  { %1570 = vmatpush3.bf16.msra.mxu1 %v1569_v63  ;;  %1476 = vmatprep.mubr.msk.f32.mxu1 %vm1710_vm4, %v1708_v20  ;;  %v968_v22 = vsel %vm967_vm7, %v1808_v57, %v966_v19  ;;  %v1563_v57 = vpack.c.bf16 %v57_v38, %v56_v37  ;;  %v68_v63 = vld [vmem:[#allocation2 + $0x150] sm:$0xff] }
 0x7bf   :  { %v1852_v5 = vadd.f32 %v869_v4, %v782_v33  ;;  %1571 = vmatprep.subr.bf16.mxu1 %v1709_v27  ;;  %v971_v23 = vsel %vm969_vm8, %v970_v21, %v968_v22  ;;  %v1602_v0 = vpack.c.bf16 %v68_v63, %v67_v62 }
 0x7c0   :  { %v972_v24 = vadd.f32 1e-08, %v971_v23  ;;  %1564 = vmatpush3.bf16.msra.mxu0 %v1563_v57 }
 0x7c1   :  { %1565 = vmatprep.subr.bf16.mxu0 %v1709_v27 }
 0x7c2   :  { %1573 = vmatpush3.bf16.msra.mxu1 %v1572_v34  ;;  %1652 = vrcp.f32 %v972_v24 }
 0x7c3   :  { %1574 = vmatprep.subr.bf16.mxu1 %v1709_v27 }
 0x7c4   :  { %1567 = vmatpush3.bf16.msra.mxu0 %v1566_v41 }
 0x7c5   :  { %1592 = vmatprep.subr.bf16.mxu0 %v1709_v27 }
 0x7c6   :  { %1576 = vmatpush3.bf16.msra.mxu1 %v1575_v8 }
 0x7c7   :  { %1577 = vmatprep.subr.bf16.mxu1 %v1709_v27 }
 0x7ca   :  { %1579 = vmatpush3.bf16.msra.mxu1 %v1578_v11 }
 0x7cb   :  { %1580 = vmatprep.subr.bf16.mxu1 %v1709_v27 }
 0x7cc   :  { %v1653_v30 = vpop.eup %1652 }
 0x7cd   :  { %v974_v36 = vmul.f32 %v1653_v30, %v1793_v42  ;;  %v953_v42 = vpop.permute.xlu0 %952 }
 0x7ce   :  { %1582 = vmatpush3.bf16.msra.mxu1 %v1581_v14  ;;  %v954_v46 = vrot.slane %v953_v42, 2 }
 0x7cf   :  { %1583 = vmatprep.subr.bf16.mxu1 %v1709_v27 }
 0x7d2   :  { %1585 = vmatpush3.bf16.msra.mxu1 %v1584_v17 }
 0x7d3   :  { %1586 = vmatprep.subr.bf16.mxu1 %v1709_v27 }
 0x7d6   :  { %1588 = vmatpush3.bf16.msra.mxu1 %v1587_v29 }
 0x7d7   :  { %1589 = vmatprep.subr.bf16.mxu1 %v1709_v27 }
 0x7da   :  { %1591 = vmatpush3.bf16.msra.mxu1 %v1590_v35 }
 0x7dd   :  { %1477 = vmatmul.mubr.f32.vlgmr.msra.gmra.mrb[10].mxu1 %v974_v36 }
 0x890   :  { %v942_v43 = vpop.f32.mrb[8].mxu1 }
 0x891   :  { %v947_v44 = vrot.slane %v942_v43, 2  ;;  %v1432_v45 = vpop.f32.mrb[9].mxu1 }
 0x893   :  { %v949_v28 = vadd.f32 %v947_v44, %v1799_v48 }
 0x895   :  { %1654 = vtanh.f32 %v949_v28 }
 0x89f   :  { %v1655_v47 = vpop.eup %1654 }
 0x8a0   :  { %v956_v49 = vmul.f32 %v1655_v47, %v954_v46 }
 0x8a2   :  { %v958_v33 = vrot.slane %v956_v49, 6 }
 0x8a4   :  { %v960_v53 = vadd.f32 %v958_v33, %v1852_v5  ;;  %v1235_v5 = vld [vmem:[#allocation2 + $0x158] ss:$0 sm:$0xff] }
 0x8a6   :  { %1442 = vmatmul.mubr.msk.f32.vlgmr.msra.gmra.mrb[10].mxu0 %vm264_vm6, %v960_v53 }
 0x8a7   :  { %1594 = vmatpush3.bf16.msra.mxu0 %v1593_v52  ;;  %1495 = vmatprep.mubr.msk.f32.mxu0 %vm1710_vm4, %v1708_v20 }
 0x8a8   :  { %1595 = vmatprep.subr.bf16.mxu0 %v1709_v27 }
 0x8ab   :  { %1597 = vmatpush3.bf16.msra.mxu0 %v1596_v56 }
 0x8ac   :  { %1598 = vmatprep.subr.bf16.mxu0 %v1709_v27 }
 0x8af   :  { %1600 = vmatpush3.bf16.msra.mxu0 %v1599_v61 }
 0x8b0   :  { %v1114_v48 = vpop.f32.mrb[10].mxu1  ;;  %1601 = vmatprep.subr.bf16.mxu0 %v1709_v27 }
 0x8b1   :  { %v1478_v58 = vpop.f32.mrb[11].mxu1 }
 0x8b3   :  { %1603 = vmatpush3.bf16.msra.mxu0 %v1602_v0 }
 0x979   :  { %v1044_v2 = vpop.f32.mrb[10].mxu0 }
 0x97a   :  { %v1115_v20 = vadd.f32 %v1114_v48, %v1044_v2  ;;  %v1443_v3 = vpop.f32.mrb[11].mxu0 }
 0x97c   :  { %v1122_v4 = vadd.f32 %v1234_v1, %v1115_v20 }
 0x97e   :  { %v1123_v34 = vmax.f32 %v1122_v4, 0.0 }
 0x980   :  { %1496 = vmatmul.mubr.msk.f32.vlgmr.msra.gmra.mrb[12].mxu0 %vm1128_vm9, %v1123_v34 }
 0xa53   :  { %v1198_v6 = vpop.f32.mrb[12].mxu0 }
 0xa54   :  { %v1199_v7 = vadd.f32 %v1235_v5, %v1198_v6  ;;  %v1497_v8 = vpop.f32.mrb[13].mxu0 }
 0xa56   :  { %1202 = vst [vmem:[#allocation5] sm:$0x3] %v1199_v7 }
 0xa57   :  { %1689 = shalt.err (!%p1686_p12)
}
 0xa58   :  { %s1690_s6 = scalar_lea.hbm %s1892_s2, 32 }
 0xa59   :  { %p1691_p13 = scmp.ne.s32.totalorder %s1892_s2, %s1690_s6  ;;  %p1694_p0 = scmp.lt.u32.totalorder %s1690_s6, %s1892_s2 }
 0xa5b   :  { %p1696_p1 = pnand %p1694_p0, %p1691_p13 }
 0xa5d   :  { %1699 = shalt.err (!%p1696_p1)
}
 0xa5e   :  { %1212 = dma.vmem_to_hbm [thread:$0]  %s1210_s30, 32, %s1892_s2, [#allocation4]  }
 0xa5f   :  { %1702 = dma.done.wait [#allocation4], 32  }
 0xa60   :  { %1703 = vsyncadd [#allocation4], 4294967264 }
 0xa61   :  { %1216 = vsyncpa [#allocation3], 1 }
 0xa62   :  { %1217 = vsyncpa [#allocation4], 1 }

</bundles_post_ra>
